<compile_context>
chip_gen: v7x
topology: tpu7x:2x2x1
jax: 0.10.0
libtpu: 0.0.40
codegen_flags: <defaults>
</compile_context>

<pallas_src>
import functools

import jax
import jax.numpy as jnp
from jax.experimental import pallas as pl
from jax.experimental.pallas import tpu as pltpu


BN_EPS = 1e-5  # nn.BatchNorm2d default
_VMEM_LIMIT = 32 * 1024 * 1024  # == v7x scoped default; tiles here need far less


def _round_up(x, m):
    return ((x + m - 1) // m) * m


# ----------------------------------------------------------------------------- kernels
def _stats_kernel(p_ref, w_ref, stats_ref, *, m_total):
    """Per M-tile: conv-as-matmul (bf16 MXU, f32 acc) -> per-tile BN (mean, M2).

    p_ref:     (TM, K)    bf16 im2col patches tile (rows >= m_total are zero padding)
    w_ref:     (K, Cp)    bf16 weight, resident (constant block index -> no re-DMA)
    stats_ref: (1, 8, Cp) f32  sublane 0 = per-channel mean over *valid* rows,
                               sublane 1 = per-channel sum of squared deviations (M2),
                               sublanes 2..7 = 0 (padding for a full 8x128 store).
    """
    tm = p_ref.shape[0]
    cp = w_ref.shape[1]
    y = jnp.dot(p_ref[...], w_ref[...], preferred_element_type=jnp.float32)  # (TM, Cp)

    row0 = pl.program_id(0) * tm
    rows = row0 + jax.lax.broadcasted_iota(jnp.int32, (tm, 1), 0)
    valid = rows < m_total                                               # (TM, 1)
    cnt = jnp.minimum(m_total - row0, tm).astype(jnp.float32)            # >= 1 by construction

    ym = jnp.where(valid, y, 0.0)
    mean = jnp.sum(ym, axis=0, keepdims=True) / cnt                      # (1, Cp)
    d = jnp.where(valid, y - mean, 0.0)
    m2 = jnp.sum(d * d, axis=0, keepdims=True)                           # (1, Cp)

    r = jax.lax.broadcasted_iota(jnp.int32, (8, cp), 0)
    blk = jnp.where(r == 0, mean, jnp.where(r == 1, m2, 0.0))            # (8, Cp), no concat temp
    stats_ref[...] = blk[None]


def _conv_bn_relu_kernel(p_ref, w_ref, scale_ref, shift_ref, out_ref):
    """Per M-tile: recompute conv tile, fused BN affine (pre-folded scale/shift) + ReLU.

    Only the Cout real channels are stored (out_ref is (TM, Cout)); the recomputed matmul
    is free in this memory-bound regime and replaces a full f32 intermediate round trip.
    """
    y = jnp.dot(p_ref[...], w_ref[...], preferred_element_type=jnp.float32)  # (TM, Cp)
    z = jnp.maximum(y * scale_ref[...] + shift_ref[...], 0.0)
    out_ref[...] = z[:, : out_ref.shape[1]]


# ----------------------------------------------------------------------------- wrapper
def basic_conv2d_forward(x_nchw, w_oihw, bias, gamma, beta, *,
                         stride=1, padding=1, block_m=2048):
    """Forward pass of BasicConv2d.  x_nchw: (N, Cin, H, W) float32, returns NCHW f32.

    `bias` is accepted for interface fidelity but not used in compute: a per-channel bias
    added before training-mode BatchNorm is exactly cancelled by the mean subtraction.
    TODO(synk): re-add the conv bias if eval-mode (running-stats) BN is ever required.
    """
    del bias  # exactly cancelled by train-mode BN (see docstring)

    N, Cin, H, W = x_nchw.shape
    Cout, Cin_w, KH, KW = w_oihw.shape
    assert Cin == Cin_w

    # --- glue: NCHW -> NHWC (bf16, fused cast), spatial pad, im2col ---------------------
    # TODO(synk): if the surrounding model tolerates NHWC, both layout transposes can go.
    x = jnp.transpose(x_nchw, (0, 2, 3, 1)).astype(jnp.bfloat16)            # (N, H, W, Cin)
    x = jnp.pad(x, ((0, 0), (padding, padding), (padding, padding), (0, 0)))
    Hout = (H + 2 * padding - KH) // stride + 1
    Wout = (W + 2 * padding - KW) // stride + 1

    slabs = []
    for kh in range(KH):
        for kw in range(KW):
            slabs.append(
                x[:, kh:kh + Hout * stride:stride, kw:kw + Wout * stride:stride, :]
            )                                                               # (N, Hout, Wout, Cin)
    patches = jnp.concatenate(slabs, axis=-1)                               # (N, Hout, Wout, K)

    M = N * Hout * Wout
    K = KH * KW * Cin                       # NOT padded to 128: full-dim last block is legal
    Cp = _round_up(Cout, 128)               # lane-dense weight / MXU-native dot output

    # TM multiple of 16 so bf16 patch rows pack full sublanes; biggest tile that fits.
    TM = _round_up(max(16, min(block_m, _round_up(M, 16))), 16)
    Mp = _round_up(M, TM)
    nt = Mp // TM

    patches = jnp.pad(patches.reshape(M, K), ((0, Mp - M), (0, 0)))         # (Mp, K) bf16
    # weight: OIHW -> (KH, KW, Cin, Cout) -> (K, Cout), matching the (kh, kw, cin) ordering
    w_mat = jnp.transpose(w_oihw, (2, 3, 1, 0)).reshape(K, Cout).astype(jnp.float32)
    w_mat = jnp.pad(w_mat, ((0, 0), (0, Cp - Cout))).astype(jnp.bfloat16)   # (K, Cp) bf16

    grid_params = pltpu.CompilerParams(
        dimension_semantics=("parallel",),
        vmem_limit_bytes=_VMEM_LIMIT,
    )

    # --- pass 1: per-tile BN statistics only (no conv intermediate written to HBM) ------
    stats = pl.pallas_call(
        functools.partial(_stats_kernel, m_total=M),
        out_shape=jax.ShapeDtypeStruct((nt, 8, Cp), jnp.float32),
        grid=(nt,),
        in_specs=[
            pl.BlockSpec((TM, K), lambda i: (i, 0)),        # patches tile (K unpadded)
            pl.BlockSpec((K, Cp), lambda i: (0, 0)),        # whole weight, resident
        ],
        out_specs=pl.BlockSpec((1, 8, Cp), lambda i: (i, 0, 0)),
        compiler_params=grid_params,
        cost_estimate=pl.CostEstimate(
            flops=2 * Mp * K * Cp + 4 * Mp * Cp,
            transcendentals=0,
            bytes_accessed=Mp * K * 2 + K * Cp * 2 + nt * 8 * Cp * 4,
        ),
    )(patches, w_mat)

    # --- glue: pooled (Chan) merge of per-tile (count, mean, M2) -> batch mean/var ------
    counts = jnp.clip(M - jnp.arange(nt) * TM, 0, TM).astype(jnp.float32)[:, None]  # (nt, 1)
    tile_mean = stats[:, 0, :]                                                      # (nt, Cp)
    tile_m2 = stats[:, 1, :]                                                        # (nt, Cp)
    mean = jnp.sum(counts * tile_mean, axis=0) / M
    m2 = jnp.sum(tile_m2, axis=0) + jnp.sum(counts * (tile_mean - mean) ** 2, axis=0)
    var = m2 / M                                    # biased variance (PyTorch BN normalization)
    inv_std = jax.lax.rsqrt(var + BN_EPS)
    # Padded channel lanes (Cout..Cp-1): var==0 -> inv_std=1/sqrt(eps)~316, but gamma_p==0
    # there and pass 2 never stores those lanes, so nothing propagates.
    gamma_p = jnp.pad(gamma.astype(jnp.float32), (0, Cp - Cout))
    beta_p = jnp.pad(beta.astype(jnp.float32), (0, Cp - Cout))
    scale = (gamma_p * inv_std).reshape(1, Cp)
    shift = (beta_p - mean * gamma_p * inv_std).reshape(1, Cp)

    # --- pass 2: recompute cheap matmul + fused BN affine + ReLU, store Cout channels ---
    out_flat = pl.pallas_call(
        _conv_bn_relu_kernel,
        out_shape=jax.ShapeDtypeStruct((Mp, Cout), jnp.float32),
        grid=(nt,),
        in_specs=[
            pl.BlockSpec((TM, K), lambda i: (i, 0)),
            pl.BlockSpec((K, Cp), lambda i: (0, 0)),
            pl.BlockSpec((1, Cp), lambda i: (0, 0)),
            pl.BlockSpec((1, Cp), lambda i: (0, 0)),
        ],
        out_specs=pl.BlockSpec((TM, Cout), lambda i: (i, 0)),
        compiler_params=grid_params,
        cost_estimate=pl.CostEstimate(
            flops=2 * Mp * K * Cp + 3 * Mp * Cp,
            transcendentals=0,
            bytes_accessed=Mp * K * 2 + K * Cp * 2 + 2 * Cp * 4 + Mp * Cout * 4,
        ),
    )(patches, w_mat, scale, shift)

    # --- glue: unpad rows, back to NCHW --------------------------------------------------
    out = out_flat[:M].reshape(N, Hout, Wout, Cout)
    return jnp.transpose(out, (0, 3, 1, 2))


# ----------------------------------------------------------------------------- reference
def _reference_forward(x_nchw, w_oihw, bias, gamma, beta, *,
                       stride=1, padding=1, matmul_dtype=jnp.float32):
    """Pure-JAX reference (same semantics as the PyTorch module, train-mode BN)."""
    y = jax.lax.conv_general_dilated(
        x_nchw.astype(matmul_dtype), w_oihw.astype(matmul_dtype),
        window_strides=(stride, stride),
        padding=[(padding, padding), (padding, padding)],
        dimension_numbers=("NCHW", "OIHW", "NCHW"),
        preferred_element_type=jnp.float32,
    ) + bias.reshape(1, -1, 1, 1)
    mean = jnp.mean(y, axis=(0, 2, 3), keepdims=True)
    var = jnp.mean((y - mean) ** 2, axis=(0, 2, 3), keepdims=True)
    y = (y - mean) * jax.lax.rsqrt(var + BN_EPS)
    y = y * gamma.reshape(1, -1, 1, 1) + beta.reshape(1, -1, 1, 1)
    return jnp.maximum(y, 0.0)


if __name__ == "__main__":
    # Small deterministic instance: in_channels=4, out_channels=8, kernel_size=3, padding=1.
    N, Cin, H, W = 2, 4, 16, 16
    Cout, KH, KW = 8, 3, 3

    key = jax.random.PRNGKey(0)
    kx, kw, kb, kg, kbt = jax.random.split(key, 5)

    x = jax.random.normal(kx, (N, Cin, H, W), dtype=jnp.float32)
    conv_w = jax.random.normal(kw, (Cout, Cin, KH, KW), dtype=jnp.float32) * 0.1
    conv_b = jax.random.normal(kb, (Cout,), dtype=jnp.float32) * 0.1
    bn_gamma = 1.0 + 0.1 * jax.random.normal(kg, (Cout,), dtype=jnp.float32)
    bn_beta = 0.1 * jax.random.normal(kbt, (Cout,), dtype=jnp.float32)

    # block_m=256 -> M=512 splits into nt=2 (even) tiles: exercises the pooled-stats merge
    # and keeps both v7x TensorCores busy.  (Default block_m=2048 targets large M.)
    out = basic_conv2d_forward(x, conv_w, conv_b, bn_gamma, bn_beta,
                               stride=1, padding=1, block_m=256)
    out = jax.block_until_ready(out)
    assert out.shape == (N, Cout, H, W), out.shape

    # Tight check vs a precision-matched (bf16 conv operands, f32 accum) reference.
    ref_bf16 = _reference_forward(x, conv_w, conv_b, bn_gamma, bn_beta,
                                  stride=1, padding=1, matmul_dtype=jnp.bfloat16)
    err_matched = float(jnp.max(jnp.abs(out - ref_bf16)))
    assert jnp.allclose(out, ref_bf16, atol=2e-3, rtol=2e-3), err_matched

    # Looser check vs the full-f32 reference (difference is bf16 MXU input rounding only).
    ref_f32 = _reference_forward(x, conv_w, conv_b, bn_gamma, bn_beta,
                                 stride=1, padding=1, matmul_dtype=jnp.float32)
    err_f32 = float(jnp.max(jnp.abs(out - ref_f32)))
    assert jnp.allclose(out, ref_f32, atol=5e-2, rtol=5e-2), err_f32

    print("KERNEL_OK")
</pallas_src>

<mosaic_0001>
module attributes {stable_mosaic.version = 11 : i64} {
  func.func @_stats_kernel(%arg0: i32, %arg1: memref<256x36xbf16, #tpu.memory_space<vmem>>, %arg2: memref<36x128xbf16, #tpu.memory_space<vmem>>, %arg3: memref<1x8x128xf32, #tpu.memory_space<vmem>>) attributes {dimension_semantics = [#tpu.dimension_semantics<parallel>], iteration_bounds = array<i64: 2>, scalar_prefetch = 0 : i64, scratch_operands = 0 : i64, tpu.core_type = #tpu.core_type<tc>, window_params = [{transform_indices = @transform_0, window_bounds = array<i64: 256, 36>}, {pipeline_mode = #tpu.pipeline_mode<synchronous>, transform_indices = @transform_1, window_bounds = array<i64: 36, 128>}, {transform_indices = @transform_2, window_bounds = array<i64: 1, 8, 128>}]} {
    %c0 = arith.constant 0 : index
    %c0_0 = arith.constant 0 : index
    %0 = vector.load %arg1[%c0, %c0_0] : memref<256x36xbf16, #tpu.memory_space<vmem>>, vector<256x36xbf16>
    %c0_1 = arith.constant 0 : index
    %c0_2 = arith.constant 0 : index
    %1 = vector.load %arg2[%c0_1, %c0_2] : memref<36x128xbf16, #tpu.memory_space<vmem>>, vector<36x128xbf16>
    %cst = arith.constant dense<0.000000e+00> : vector<256x128xf32>
    %2 = tpu.matmul %0, %1, %cst {dimension_numbers = #tpu.dot_dimension_numbers<[1], [0], [0], [1], [0, 0, 1, 1], [], []>} : vector<256x36xbf16>, vector<36x128xbf16>, vector<256x128xf32> -> vector<256x128xf32>
    %c256_i32 = arith.constant 256 : i32
    %3 = arith.muli %arg0, %c256_i32 : i32
    %4 = tpu.iota {dimensions = array<i32: 0>} : vector<256x1xi32>
    %5 = vector.broadcast %3 : i32 to vector<256x1xi32>
    %6 = arith.addi %5, %4 : vector<256x1xi32>
    %c512_i32 = arith.constant 512 : i32
    %7 = vector.broadcast %c512_i32 : i32 to vector<256x1xi32>
    %8 = arith.cmpi slt, %6, %7 : vector<256x1xi32>
    %c512_i32_3 = arith.constant 512 : i32
    %9 = arith.subi %c512_i32_3, %3 : i32
    %c256_i32_4 = arith.constant 256 : i32
    %10 = arith.minsi %9, %c256_i32_4 : i32
    %11 = arith.sitofp %10 : i32 to f32
    %cst_5 = arith.constant 0.000000e+00 : f32
    %12 = vector.shape_cast %8 : vector<256x1xi1> to vector<256x1xi1>
    %13 = vector.broadcast %12 : vector<256x1xi1> to vector<256x128xi1>
    %14 = vector.broadcast %cst_5 : f32 to vector<256x128xf32>
    %15 = arith.select %13, %2, %14 : vector<256x128xi1>, vector<256x128xf32>
    %cst_6 = arith.constant dense<0.000000e+00> : vector<128xf32>
    %16 = vector.multi_reduction <add>, %15, %cst_6 [0] : vector<256x128xf32> to vector<128xf32>
    %17 = vector.shape_cast %16 : vector<128xf32> to vector<1x128xf32>
    %18 = vector.broadcast %11 : f32 to vector<1x128xf32>
    %19 = arith.divf %17, %18 : vector<1x128xf32>
    %20 = vector.broadcast %19 : vector<1x128xf32> to vector<256x128xf32>
    %21 = arith.subf %2, %20 : vector<256x128xf32>
    %cst_7 = arith.constant 0.000000e+00 : f32
    %22 = vector.shape_cast %8 : vector<256x1xi1> to vector<256x1xi1>
    %23 = vector.broadcast %22 : vector<256x1xi1> to vector<256x128xi1>
    %24 = vector.broadcast %cst_7 : f32 to vector<256x128xf32>
    %25 = arith.select %23, %21, %24 : vector<256x128xi1>, vector<256x128xf32>
    %26 = arith.mulf %25, %25 : vector<256x128xf32>
    %cst_8 = arith.constant dense<0.000000e+00> : vector<128xf32>
    %27 = vector.multi_reduction <add>, %26, %cst_8 [0] : vector<256x128xf32> to vector<128xf32>
    %28 = vector.shape_cast %27 : vector<128xf32> to vector<1x128xf32>
    %29 = tpu.iota {dimensions = array<i32: 0>} : vector<8x128xi32>
    %c0_i32 = arith.constant 0 : i32
    %30 = vector.broadcast %c0_i32 : i32 to vector<8x128xi32>
    %31 = arith.cmpi eq, %29, %30 : vector<8x128xi32>
    %c1_i32 = arith.constant 1 : i32
    %32 = vector.broadcast %c1_i32 : i32 to vector<8x128xi32>
    %33 = arith.cmpi eq, %29, %32 : vector<8x128xi32>
    %cst_9 = arith.constant 0.000000e+00 : f32
    %34 = vector.shape_cast %28 : vector<1x128xf32> to vector<1x128xf32>
    %35 = vector.broadcast %34 : vector<1x128xf32> to vector<8x128xf32>
    %36 = vector.broadcast %cst_9 : f32 to vector<8x128xf32>
    %37 = arith.select %33, %35, %36 : vector<8x128xi1>, vector<8x128xf32>
    %38 = vector.shape_cast %19 : vector<1x128xf32> to vector<1x128xf32>
    %39 = vector.broadcast %38 : vector<1x128xf32> to vector<8x128xf32>
    %40 = arith.select %31, %39, %37 : vector<8x128xi1>, vector<8x128xf32>
    %41 = vector.shape_cast %40 : vector<8x128xf32> to vector<1x8x128xf32>
    %c0_10 = arith.constant 0 : index
    %c0_11 = arith.constant 0 : index
    %c0_12 = arith.constant 0 : index
    %42 = vector.load %arg3[%c0_10, %c0_11, %c0_12] : memref<1x8x128xf32, #tpu.memory_space<vmem>>, vector<1x8x128xf32>
    tpu.vector_store %arg3[%c0_10, %c0_11, %c0_12], %41 {strides = array<i32>} : memref<1x8x128xf32, #tpu.memory_space<vmem>>, vector<1x8x128xf32>,
    return
  }
  func.func @transform_0(%arg0: i32) -> (i32, i32) {
    %c0_i32 = arith.constant 0 : i32
    %c0_i32_0 = arith.constant 0 : i32
    return %arg0, %c0_i32 : i32, i32
  }
  func.func @transform_1(%arg0: i32) -> (i32, i32) {
    %c0_i32 = arith.constant 0 : i32
    %c0_i32_0 = arith.constant 0 : i32
    %c0_i32_1 = arith.constant 0 : i32
    return %c0_i32, %c0_i32_0 : i32, i32
  }
  func.func @transform_2(%arg0: i32) -> (i32, i32, i32) {
    %c0_i32 = arith.constant 0 : i32
    %c0_i32_0 = arith.constant 0 : i32
    %c0_i32_1 = arith.constant 0 : i32
    return %arg0, %c0_i32, %c0_i32_0 : i32, i32, i32
  }
}

</mosaic_0001>

<bundles_post_ra>
// kernel: tpu_custom_call.1
= control target key start
LH: loop header
LB: loop body
LE: loop exit
PB: predicated region body
PF: predicated region fallthrough
CT: control target
= control target key end

     0   :  { %7 = vsyncpa [#allocation3], 0  ;;  %s1795_s0 = inlined_call_operand.vmem [shape: bf16[512,36], index: 0, kind: input, shape index: {}]   ;;  %s1796_s1 = inlined_call_operand.vmem [shape: bf16[36,128], index: 1, kind: input, shape index: {}]   ;;  %s1797_s2 = inlined_call_operand.hbm [shape: f32[2,8,128], index: 2, kind: output, shape index: {}]  }
   0x1   :  { %9 = vsyncpa [#allocation3 + $0x1], 0  ;;  %s1193_s9 = smov 0   ;;  %s1195_s10 = smov 0  }
   0x2   :  { %s1197_s11 = smov 0   ;;  %s1199_s12 = smov 0  }
   0x3 LB: > { %s1214_s13 = sadd.s32 4294967295, %s1175_s12   ;;  %s941_s14 = sadd.s32 4294967294, %s1175_s12   ;;  %s1175_s12 = sphi %s1199_s12, %s1884_s12   ;;  %s1171_s11 = sphi %s1197_s11, %s1883_s11   ;;  %s1167_s10 = sphi %s1195_s10, %s1882_s10   ;;  %s1163_s9 = sphi %s1193_s9, %s1881_s9  }
   0x4   : > { %s1218_s15 = sadd.s32 1, %s1175_s12   ;;  %s69_s16 = sadd.s32 1, %s1171_s11 }
   0x5   : > { %s66_s17 = ssub.s32 %s1175_s12, %s1218_s15  ;;  %p79_p0 = scmp.ne.s32.totalorder %s1171_s11, %s1167_s10 }
   0x6   : > { %p67_p1 = scmp.eq.s32.totalorder %s66_s17, 0  ;;  %p80_p2 = scmp.eq.s32.totalorder %s1214_s13, 1 }
   0x7   : > { %p85_p3 = scmp.ne.s32.totalorder %s1167_s10, %s1163_s9  ;;  %p86_p4 = scmp.eq.s32.totalorder %s941_s14, 1 }
   0x8   : > { %s1229_s18 = scalar_select %p67_p1, %s1171_s11, %s69_s16  }
   0x9   : > { %p1231_p5 = por %p80_p2, %p79_p0  ;;  %p1235_p6 = por %p86_p4, %p85_p3 }
   0xa   : > { %p944_p7 = scmp.ge.s32.totalorder %s1175_s12, 1  ;;  %p116_p8 = scmp.lt.s32.totalorder %s1175_s12, 3 }
   0xc   : > { %p117_p9 = pnand %p944_p7, %p116_p8 }
   0xe   : > { %120 = sbr.rel (%p117_p9) target bundleno = 422 (0x1a6), region = 28 }
  0x15   : > { %v1092_v0 = vld [vmem:[%s1796_s1] sm:$0xff]   ;;  %v1093_v1 = vld [vmem:[%s1796_s1 + $0x8] sm:$0xff]   ;;  %s946_s25 = sshll.u32 %s1214_s13, 5  ;;  %v1094_v2 = vld [vmem:[%s1796_s1 + $0x10] ss:$0 sps:$4 sm:$0x33]   ;;  %v492_v20 = vlaneseq }
  0x16   : > { %1007 = vmatprep.subr.bf16.mxu0 %v1092_v0  ;;  %p139_p10 = scmp.lt.s32.totalorder %s946_s25, 63  ;;  %1045 = vmatprep.subr.bf16.mxu1 %v1092_v0  ;;  %vm326_vm0 = vcmask 1041408   ;;  %vm277_vm1 = vcmask 293888   ;;  %s983_s4 = sshll.u32 %s1214_s13, 8 }
  0x17   : > { %1008 = vmatpush3.bf16.msra.mxu0 %v1092_v0  ;;  %1048 = vmatpush3.bf16.msra.mxu1 %v1092_v0  ;;  %v328_v3 = vsel %vm326_vm0, %v1094_v2, 0  ;;  %v1289_v21 = vshrl.u32 %v492_v20, 7  ;;  %v1294_v23 = vstv %s983_s4  ;;  %s590_s5 = ssub.s32 512, %s983_s4  ;;  %s135_s7 = sand.u32 1, %s1167_s10  }
  0x18   : > { %1009 = vmatprep.subr.bf16.mxu0 %v1093_v1  ;;  %s1886_s25 = smov (!%p139_p10, %s946_s25), 63  ;;  %1046 = vmatprep.subr.bf16.mxu1 %v1093_v1  ;;  %p591_p11 = scmp.lt.s32.totalorder %s590_s5, 256 }
  0x19   : > { %s947_s28 = sshll.u32 %s1886_s25, 2  ;;  %1833 = vst [vmem:[#allocation5_spill] sm:$0xff] %v1289_v21  ;;  %v494_v22 = vadd.s32 8, %v1289_v21  ;;  %v495_v24 = vadd.s32 16, %v1289_v21  ;;  %v1299_v25 = vadd.s32 %v1294_v23, %v1289_v21  ;;  %v496_v26 = vadd.s32 24, %v1289_v21  ;;  %s945_s8 = sshll.u32 %s135_s7, 3 }
  0x1a   : > { %s1254_s3 = scalar_lea.vmem %s1795_s0, %s947_s28  ;;  %v497_v29 = vadd.s32 32, %v1289_v21  ;;  %v498_v33 = vadd.s32 40, %v1289_v21  ;;  %v499_v36 = vadd.s32 48, %v1289_v21  ;;  %v500_v41 = vadd.s32 56, %v1289_v21  ;;  %s1888_s5 = smov (!%p591_p11, %s590_s5), 256 }
  0x1b   : > { %1010 = vmatpush3.bf16.msra.mxu0 %v1093_v1  ;;  %1049 = vmatpush3.bf16.msra.mxu1 %v1093_v1  ;;  %v1095_v4 = vld [vmem:[%s1254_s3] sm:$0xff]   ;;  %v1096_v5 = vld [vmem:[%s1254_s3 + $0x8] sm:$0xff]   ;;  %v1097_v6 = vld [vmem:[%s1254_s3 + $0x10] sm:$0xff]   ;;  %v1303_v27 = vadd.s32 %v1294_v23, %v494_v22  ;;  %v1306_v28 = vadd.s32 %v1294_v23, %v495_v24  ;;  %vm558_vm2 = vcmp.lt.s32.totalorder %v1299_v25, 512  ;;  %v1315_v32 = vadd.s32 %v1294_v23, %v496_v26  ;;  %s593_s6 = scvt.s32.f32 %s1888_s5  ;;  %s985_s14 = sshll.u32 %s1214_s13, 7 }
  0x1c   : > { %1051 = vmatprep.subr.msk.bf16.mxu0 %vm326_vm0, %v1094_v2  ;;  %1052 = vmatprep.subr.msk.bf16.mxu1 %vm326_vm0, %v1094_v2  ;;  %v1098_v7 = vld [vmem:[%s1254_s3 + $0x18] sm:$0xff]   ;;  %v1103_v8 = vld [vmem:[%s1254_s3 + $0x40] sm:$0xff]   ;;  %v1104_v9 = vld [vmem:[%s1254_s3 + $0x48] sm:$0xff]   ;;  %v1326_v37 = vadd.s32 %v1294_v23, %v497_v29  ;;  %v1337_v42 = vadd.s32 %v1294_v23, %v498_v33  ;;  %v1347_v47 = vadd.s32 %v1294_v23, %v499_v36  ;;  %v501_v48 = vadd.s32 64, %v1289_v21  ;;  %s137_s16 = scalar_lea.vmem [#allocation2], %s945_s8  ;;  %s1752_s23 = scalar_lea.hbm %s1797_s2, %s985_s14 }
  0x1d   : > { %1013 = vmatprep.mubr.msk.bf16.mxu0 %vm277_vm1, %v1095_v4  ;;  %1029 = vmatprep.mubr.msk.bf16.mxu1 %vm277_vm1, %v1103_v8  ;;  %v1105_v10 = vld [vmem:[%s1254_s3 + $0x50] sm:$0xff]   ;;  %v1099_v11 = vld [vmem:[%s1254_s3 + $0x20] sm:$0xff]   ;;  %v1106_v12 = vld [vmem:[%s1254_s3 + $0x58] sm:$0xff]   ;;  %vm559_vm3 = vcmp.lt.s32.totalorder %v1303_v27, 512  ;;  %vm560_vm4 = vcmp.lt.s32.totalorder %v1306_v28, 512  ;;  %vm561_vm5 = vcmp.lt.s32.totalorder %v1315_v32, 512  ;;  %v1363_v55 = vadd.s32 %v1294_v23, %v500_v41 }
  0x1e   : > { %v1107_v13 = vld [vmem:[%s1254_s3 + $0x60] sm:$0xff]   ;;  %v1100_v14 = vld [vmem:[%s1254_s3 + $0x28] sm:$0xff]   ;;  %v1101_v15 = vld [vmem:[%s1254_s3 + $0x30] sm:$0xff]   ;;  %vm562_vm6 = vcmp.lt.s32.totalorder %v1326_v37, 512  ;;  %vm563_vm7 = vcmp.lt.s32.totalorder %v1337_v42, 512  ;;  %v502_v56 = vadd.s32 72, %v1289_v21  ;;  %v1377_v62 = vadd.s32 %v1294_v23, %v501_v48 }
  0x1f   : > { %1012 = vmatpush3.bf16.msra.mxu0 %v328_v3  ;;  %1050 = vmatpush3.bf16.msra.mxu1 %v328_v3  ;;  %v1108_v16 = vld [vmem:[%s1254_s3 + $0x68] sm:$0xff]   ;;  %v1109_v17 = vld [vmem:[%s1254_s3 + $0x70] sm:$0xff]   ;;  %v1102_v18 = vld [vmem:[%s1254_s3 + $0x38] sm:$0xff]   ;;  %vm564_vm8 = vcmp.lt.s32.totalorder %v1347_v47, 512  ;;  %v503_v61 = vadd.s32 80, %v1289_v21  ;;  %vm565_vm9 = vcmp.lt.s32.totalorder %v1363_v55, 512 }
  0x20   : > { %v1110_v19 = vld [vmem:[%s1254_s3 + $0x78] sm:$0xff]   ;;  %v504_v1 = vadd.s32 88, %v1289_v21  ;;  %v1385_v2 = vadd.s32 %v1294_v23, %v502_v56  ;;  %vm566_vm10 = vcmp.lt.s32.totalorder %v1377_v62, 512  ;;  %v505_v8 = vadd.s32 96, %v1289_v21  ;;  %s882_s17 = sshll.u32 %s137_s16, 4  ;;  %s869_s13 = scalar_lea.sflag [#allocation3], %s135_s7  ;;  %s1754_s17 = int_to_ptr.vmem [resolvable:$true] %s882_s17 }
  0x21   : > { %v507_v22 = vadd.s32 112, %v1289_v21  ;;  %v508_v29 = vadd.s32 120, %v1289_v21  ;;  %s1113_s24 = scalar_lea.vmem %s1754_s17, 128  ;;  %s1177_s25 = smov [#allocation2]  }
  0x22   : > { %1014 = vmatmul.mubr.msk.bf16.vlgmr.msra.gmra.mrb[0].mxu0 %vm277_vm1, %v1096_v5  ;;  %1030 = vmatmul.mubr.msk.bf16.vlgmr.msra.gmra.mrb[0].mxu1 %vm277_vm1, %v1104_v9  ;;  %vm567_vm11 = vcmp.lt.s32.totalorder %v1385_v2, 512  ;;  %v1425_v24 = vadd.s32 %v1294_v23, %v505_v8  ;;  %p1114_p12 = scmp.ne.s32.totalorder %s1754_s17, %s1113_s24  ;;  %s1117_s26 = sshll.u32 %s1177_s25, 4  ;;  %s1118_s26 = int_to_ptr.vmem [resolvable:$false] %s1117_s26 }
  0x23   : > { %1017 = vmatprep.mubr.msk.bf16.mxu0 %vm277_vm1, %v1097_v6  ;;  %1033 = vmatprep.mubr.msk.bf16.mxu1 %vm277_vm1, %v1105_v10  ;;  %v1455_v56 = vadd.s32 %v1294_v23, %v508_v29  ;;  %s1119_s27 = scalar_lea.vmem %s1118_s26, 256  ;;  %p1120_p1 = scmp.lt.s32.totalorder %s1754_s17, %s1118_s26 }
  0x24   : > { %vm1798_vm14 = vcmp.lt.s32.totalorder %v1425_v24, 512  ;;  %p1115_p13 = pnand %p1114_p12, %p1231_p5  ;;  %p1121_p2 = scmp.lt.s32.totalorder %s1119_s27, %s1113_s24 }
  0x25   : > { %1835 = vst [vmem:[#allocation7_spill] sm:$0xff] %v1455_v56 }
  0x26   : > { %p1116_p0 = pneg %p1115_p13  ;;  %p1122_p3 = por %p1121_p2, %p1120_p1 }
  0x28   : > { %p1123_p4 = pnand %p1122_p3, %p1116_p0 }
  0x2a   : > { %1018 = vmatmul.mubr.msk.bf16.gmra.mrb[4].mxu0 %vm277_vm1, %v1098_v7  ;;  %1034 = vmatmul.mubr.msk.bf16.gmra.mrb[4].mxu1 %vm277_vm1, %v1106_v12  ;;  %v1395_v7 = vadd.s32 %v1294_v23, %v503_v61 }
  0x2b   : > { %1021 = vmatprep.mubr.msk.bf16.mxu0 %vm277_vm1, %v1099_v11  ;;  %1037 = vmatprep.mubr.msk.bf16.mxu1 %vm277_vm1, %v1107_v13 }
  0x2c   : > { %vm1823_vm12 = vcmp.lt.s32.totalorder %v1395_v7, 512 }
  0x32   : > { %1022 = vmatmul.mubr.msk.bf16.gmra.mrb[8].mxu0 %vm277_vm1, %v1100_v14  ;;  %1038 = vmatmul.mubr.msk.bf16.gmra.mrb[8].mxu1 %vm277_vm1, %v1108_v16  ;;  %v506_v16 = vadd.s32 104, %v1289_v21 }
  0x33   : > { %1025 = vmatprep.mubr.msk.bf16.mxu0 %vm277_vm1, %v1101_v15  ;;  %1041 = vmatprep.mubr.msk.bf16.mxu1 %vm277_vm1, %v1109_v17  ;;  %v1411_v15 = vadd.s32 %v1294_v23, %v504_v1 }
  0x34   : > { %v1433_v36 = vadd.s32 %v1294_v23, %v506_v16  ;;  %v512_v16 = vadd.s32 152, %v1289_v21 }
  0x35   : > { %vm1800_vm13 = vcmp.lt.s32.totalorder %v1411_v15, 512 }
  0x36   : > { %vm571_vm15 = vcmp.lt.s32.totalorder %v1433_v36, 512 }
  0x3a   : > { %1026 = vmatmul.mubr.msk.bf16.gmra.mrb[12].mxu0 %vm277_vm1, %v1102_v18  ;;  %1042 = vmatmul.mubr.msk.bf16.gmra.mrb[12].mxu1 %vm277_vm1, %v1110_v19  ;;  %vm1802_vm1 = vcmp.lt.s32.totalorder %v1455_v56, 512 }
  0xf5   : > { %v1309_v30 = vpop.f32.mrb[0].mxu0  ;;  %v1339_v43 = vpop.f32.mrb[0].mxu1 }
  0xf6   : > { %v1311_v31 = vpop.f32.mrb[1].mxu0  ;;  %v660_v44 = vsel %vm560_vm4, %v1309_v30, 0.0  ;;  %v1344_v45 = vpop.f32.mrb[1].mxu1 }
  0xf7   : > { %v1319_v34 = vpop.f32.mrb[2].mxu0  ;;  %v658_v38 = vsel %vm558_vm2, %v1311_v31, 0.0  ;;  %v1351_v49 = vpop.f32.mrb[2].mxu1 }
  0xf8   : > { %v1322_v35 = vpop.f32.mrb[3].mxu0  ;;  %v661_v50 = vsel %vm561_vm5, %v1319_v34, 0.0  ;;  %v1358_v52 = vpop.f32.mrb[3].mxu1 }
  0xf9   : > { %v659_v39 = vsel %vm559_vm3, %v1322_v35, 0.0 }
  0xfa   : > { %v690_v40 = vadd.f32 %v659_v39, %v658_v38  ;;  %v509_v38 = vadd.s32 128, %v1289_v21 }
  0xfc   : > { %v691_v46 = vadd.f32 %v690_v40, %v660_v44 }
  0xfd   : > { %v1356_v51 = vpop.f32.mrb[4].mxu0  ;;  %v1387_v3 = vpop.f32.mrb[4].mxu1 }
  0xfe   : > { %v1360_v53 = vpop.f32.mrb[5].mxu0  ;;  %v692_v54 = vadd.f32 %v691_v46, %v661_v50  ;;  %v664_v4 = vsel %vm564_vm8, %v1356_v51, 0.0  ;;  %v1392_v5 = vpop.f32.mrb[5].mxu1  ;;  %v1444_v46 = vadd.s32 %v1294_v23, %v507_v22  ;;  %v513_v22 = vadd.s32 160, %v1289_v21 }
  0xff   : > { %v662_v57 = vsel %vm562_vm6, %v1360_v53, 0.0  ;;  %v1370_v58 = vpop.f32.mrb[6].mxu0  ;;  %v1399_v9 = vpop.f32.mrb[6].mxu1 }
 0x100   : > { %v693_v59 = vadd.f32 %v692_v54, %v662_v57  ;;  %v1373_v60 = vpop.f32.mrb[7].mxu0  ;;  %v665_v10 = vsel %vm565_vm9, %v1370_v58, 0.0  ;;  %v1406_v12 = vpop.f32.mrb[7].mxu1  ;;  %vm1799_vm0 = vcmp.lt.s32.totalorder %v1444_v46, 512 }
 0x101   : > { %v663_v63 = vsel %vm563_vm7, %v1373_v60, 0.0 }
 0x102   : > { %v694_v0 = vadd.f32 %v693_v59, %v663_v63  ;;  %v1463_v63 = vadd.s32 %v1294_v23, %v509_v38 }
 0x104   : > { %v695_v6 = vadd.f32 %v694_v0, %v664_v4  ;;  %1836 = vst [vmem:[#allocation8_spill] sm:$0xff] %v1463_v63  ;;  %v510_v0 = vadd.s32 136, %v1289_v21 }
 0x105   : > { %v1404_v11 = vpop.f32.mrb[8].mxu0  ;;  %v1436_v39 = vpop.f32.mrb[8].mxu1 }
 0x106   : > { %v1408_v13 = vpop.f32.mrb[9].mxu0  ;;  %v696_v14 = vadd.f32 %v695_v6, %v665_v10  ;;  %v668_v40 = vsel %vm1823_vm12, %v1404_v11, 0.0  ;;  %v1441_v41 = vpop.f32.mrb[9].mxu1  ;;  %v511_v10 = vadd.s32 144, %v1289_v21 }
 0x107   : > { %v666_v17 = vsel %vm566_vm10, %v1408_v13, 0.0  ;;  %v1418_v18 = vpop.f32.mrb[10].mxu0  ;;  %v1447_v48 = vpop.f32.mrb[10].mxu1 }
 0x108   : > { %v697_v19 = vadd.f32 %v696_v14, %v666_v17  ;;  %v1421_v20 = vpop.f32.mrb[11].mxu0  ;;  %1834 = vst [vmem:[#allocation6_spill] sm:$0xff] %v1447_v48  ;;  %v669_v50 = vsel %vm1800_vm13, %v1418_v18, 0.0  ;;  %v1457_v57 = vpop.f32.mrb[11].mxu1 }
 0x109   : > { %v667_v26 = vsel %vm567_vm11, %v1421_v20, 0.0 }
 0x10a   : > { %v698_v33 = vadd.f32 %v697_v19, %v667_v26  ;;  %v1482_v19 = vadd.s32 %v1294_v23, %v510_v0  ;;  %v1504_v0 = vadd.s32 %v1294_v23, %v512_v16 }
 0x10c   : > { %v699_v44 = vadd.f32 %v698_v33, %v668_v40  ;;  %1837 = vst [vmem:[#allocation9_spill] sm:$0xff] %v1482_v19  ;;  %v1493_v40 = vadd.s32 %v1294_v23, %v511_v10  ;;  %1840 = vst [vmem:[#allocation12_spill] sm:$0xff] %v1504_v0  ;;  %v1510_v10 = vadd.s32 %v1294_v23, %v513_v22 }
 0x10d   : > { %v1452_v54 = vpop.f32.mrb[12].mxu0  ;;  %v1485_v26 = vpop.f32.mrb[12].mxu1 }
 0x10e   : > { %v1459_v59 = vpop.f32.mrb[13].mxu0  ;;  %v700_v61 = vadd.f32 %v699_v44, %v669_v50  ;;  %v672_v29 = vsel %vm1799_vm0, %v1452_v54, 0.0  ;;  %v1490_v33 = vpop.f32.mrb[13].mxu1  ;;  %1839 = vst [vmem:[#allocation11_spill] sm:$0xff] %v1493_v40  ;;  %vm1806_vm0 = vcmp.lt.s32.totalorder %v1482_v19, 512  ;;  %1841 = vst [vmem:[#allocation13_spill] sm:$0xff] %v1510_v10 }
 0x10f   : > { %v670_v1 = vsel %vm1798_vm14, %v1459_v59, 0.0  ;;  %v1469_v4 = vpop.f32.mrb[14].mxu0  ;;  %vm1801_vm14 = vcmp.lt.s32.totalorder %v1463_v63, 512  ;;  %1838 = vst [vmem:[#allocation10_spill] sm:$0xff] %v1490_v33  ;;  %v1495_v44 = vpop.f32.mrb[14].mxu1  ;;  %vm1808_vm13 = vcmp.lt.s32.totalorder %v1493_v40, 512 }
 0x110   : > { %v701_v6 = vadd.f32 %v700_v61, %v670_v1  ;;  %v1472_v8 = vpop.f32.mrb[15].mxu0  ;;  %v673_v50 = vsel %vm1802_vm1, %v1469_v4, 0.0  ;;  %v674_v61 = vsel %vm1801_vm14, %v1344_v45, 0.0  ;;  %v1506_v1 = vpop.f32.mrb[15].mxu1  ;;  %vm1809_vm14 = vcmp.lt.s32.totalorder %v1504_v0, 512 }
 0x111   : > { %v671_v14 = vsel %vm571_vm15, %v1472_v8, 0.0  ;;  %v675_v16 = vsel %vm1806_vm0, %v1358_v52, 0.0  ;;  %vm1810_vm1 = vcmp.lt.s32.totalorder %v1510_v10, 512  ;;  %v517_v63 = vadd.s32 192, %v1289_v21 }
 0x112   : > { %v702_v17 = vadd.f32 %v701_v6, %v671_v14  ;;  %v514_v14 = vadd.s32 168, %v1289_v21  ;;  %v677_v19 = vsel %vm1809_vm14, %v1351_v49, 0.0  ;;  %v521_v10 = vadd.s32 224, %v1289_v21 }
 0x113   : > { %v1542_v40 = vadd.s32 %v1294_v23, %v517_v63 }
 0x114   : > { %v703_v38 = vadd.f32 %v702_v17, %v672_v29  ;;  %v515_v29 = vadd.s32 176, %v1289_v21  ;;  %v1522_v22 = vadd.s32 %v1294_v23, %v514_v14 }
 0x115   : > { %1844 = vst [vmem:[#allocation16_spill] sm:$0xff] %v1542_v40 }
 0x116   : > { %v704_v6 = vadd.f32 %v703_v38, %v673_v50  ;;  %v516_v38 = vadd.s32 184, %v1289_v21  ;;  %1842 = vst [vmem:[#allocation14_spill] sm:$0xff] %v1522_v22  ;;  %v1529_v56 = vadd.s32 %v1294_v23, %v515_v29  ;;  %vm1814_vm0 = vcmp.lt.s32.totalorder %v1522_v22, 512 }
 0x117   : > { %v518_v29 = vadd.s32 200, %v1289_v21 }
 0x118   : > { %v705_v17 = vadd.f32 %v704_v6, %v674_v61  ;;  %v676_v61 = vsel %vm1808_vm13, %v1339_v43, 0.0  ;;  %v1538_v14 = vadd.s32 %v1294_v23, %v516_v38  ;;  %vm1815_vm13 = vcmp.lt.s32.totalorder %v1529_v56, 512 }
 0x119   : > { %v679_v38 = vsel %vm1814_vm0, %v1406_v12, 0.0  ;;  %v1554_v63 = vadd.s32 %v1294_v23, %v518_v29 }
 0x11a   : > { %v706_v50 = vadd.f32 %v705_v17, %v675_v16  ;;  %v678_v17 = vsel %vm1810_vm1, %v1392_v5, 0.0  ;;  %1843 = vst [vmem:[#allocation15_spill] sm:$0xff] %v1538_v14  ;;  %vm1817_vm14 = vcmp.lt.s32.totalorder %v1538_v14, 512  ;;  %vm1819_vm1 = vcmp.lt.s32.totalorder %v1542_v40, 512 }
 0x11b   : > { %1845 = vst [vmem:[#allocation17_spill] sm:$0xff] %v1554_v63  ;;  %v681_v22 = vsel %vm1817_vm14, %v1399_v9, 0.0  ;;  %v682_v29 = vsel %vm1819_vm1, %v1441_v41, 0.0  ;;  %vm1822_vm0 = vcmp.lt.s32.totalorder %v1554_v63, 512  ;;  %v523_v14 = vadd.s32 240, %v1289_v21 }
 0x11c   : > { %v707_v6 = vadd.f32 %v706_v50, %v676_v61  ;;  %v519_v61 = vadd.s32 208, %v1289_v21 }
 0x11e   : > { %v708_v16 = vadd.f32 %v707_v6, %v677_v19  ;;  %v520_v19 = vadd.s32 216, %v1289_v21  ;;  %v1561_v0 = vadd.s32 %v1294_v23, %v519_v61  ;;  %v522_v61 = vadd.s32 232, %v1289_v21 }
 0x120   : > { %v709_v50 = vadd.f32 %v708_v16, %v678_v17  ;;  %v680_v17 = vsel %vm1815_vm13, %v1387_v3, 0.0  ;;  %1846 = vst [vmem:[#allocation18_spill] sm:$0xff] %v1561_v0  ;;  %vm1825_vm13 = vcmp.lt.s32.totalorder %v1561_v0, 512 }
 0x122   : > { %v710_v6 = vadd.f32 %v709_v50, %v679_v38  ;;  %v1570_v50 = vadd.s32 %v1294_v23, %v520_v19  ;;  %v683_v19 = vsel %vm1822_vm0, %v1457_v57, 0.0 }
 0x124   : > { %v711_v16 = vadd.f32 %v710_v6, %v680_v17  ;;  %1847 = vst [vmem:[#allocation19_spill] sm:$0xff] %v1570_v50  ;;  %v1574_v6 = vadd.s32 %v1294_v23, %v521_v10  ;;  %vm585_vm14 = vcmp.lt.s32.totalorder %v1570_v50, 512  ;;  %v555_v10 = vadd.s32 %v1294_v23, %v522_v61 }
 0x126   : > { %v712_v38 = vadd.f32 %v711_v16, %v681_v22  ;;  %1848 = vst [vmem:[#allocation20_spill] sm:$0xff] %v1574_v6  ;;  %vm586_vm1 = vcmp.lt.s32.totalorder %v1574_v6, 512  ;;  %v524_v22 = vadd.s32 248, %v1289_v21  ;;  %v684_v16 = vsel %vm1825_vm13, %v1436_v39, 0.0 }
 0x127   : > { %vm587_vm0 = vcmp.lt.s32.totalorder %v555_v10, 512 }
 0x128   : > { %v713_v17 = vadd.f32 %v712_v38, %v682_v29  ;;  %v1592_v38 = vadd.s32 %v1294_v23, %v523_v14  ;;  %v557_v21 = vadd.s32 %v1294_v23, %v524_v22 }
 0x12a   : > { %v714_v40 = vadd.f32 %v713_v17, %v683_v19  ;;  %v685_v17 = vsel %vm585_vm14, %v1447_v48, 0.0  ;;  %v686_v19 = vsel %vm586_vm1, %v1490_v33, 0.0  ;;  %vm588_vm12 = vcmp.lt.s32.totalorder %v1592_v38, 512 }
 0x12b   : > { %vm589_vm13 = vcmp.lt.s32.totalorder %v557_v21, 512 }
 0x12c   : > { %v715_v29 = vadd.f32 %v714_v40, %v684_v16  ;;  %v687_v40 = vsel %vm587_vm0, %v1506_v1, 0.0  ;;  %v688_v16 = vsel %vm588_vm12, %v1485_v26, 0.0 }
 0x12e   : > { %v716_v61 = vadd.f32 %v715_v29, %v685_v17  ;;  %v689_v29 = vsel %vm589_vm13, %v1495_v44, 0.0  ;;  %v727_v17 = vstv %s593_s6 }
 0x12f   : > { %1111 = vrcp.f32 %v727_v17 }
 0x130   : > { %v717_v0 = vadd.f32 %v716_v61, %v686_v19 }
 0x132   : > { %v718_v14 = vadd.f32 %v717_v0, %v687_v40 }
 0x134   : > { %v719_v6 = vadd.f32 %v718_v14, %v688_v16 }
 0x136   : > { %v720_v23 = vadd.f32 %v719_v6, %v689_v29 }
 0x138   : > { %v721_v22 = vrot.slane %v720_v23, 4 }
 0x139   : > { %v1112_v48 = vpop.eup %1111 }
 0x13a   : > { %v722_v50 = vadd.f32 %v721_v22, %v720_v23 }
 0x13c   : > { %v723_v19 = vrot.slane %v722_v50, 2 }
 0x13e   : > { %v724_v61 = vadd.f32 %v723_v19, %v722_v50 }
 0x140   : > { %v725_v33 = vrot.slane %v724_v61, 1 }
 0x142   : > { %v726_v63 = vadd.f32 %v725_v33, %v724_v61 }
 0x144   : > { %v1609_v0 = vmul.f32 %v1112_v48, %v726_v63 }
 0x146   : > { %v743_v40 = vsub.f32 %v1472_v8, %v1609_v0  ;;  %v759_v14 = vsub.f32 %v1506_v1, %v1609_v0  ;;  %v761_v6 = vsub.f32 %v1495_v44, %v1609_v0  ;;  %v730_v50 = vsub.f32 %v1311_v31, %v1609_v0 }
 0x147   : > { %v731_v33 = vsub.f32 %v1322_v35, %v1609_v0  ;;  %v732_v1 = vsub.f32 %v1309_v30, %v1609_v0  ;;  %v733_v31 = vsub.f32 %v1319_v34, %v1609_v0  ;;  %v734_v10 = vsub.f32 %v1360_v53, %v1609_v0 }
 0x148   : > { %v775_v16 = vsel %vm571_vm15, %v743_v40, 0.0  ;;  %v1624_v48 = vsel %vm587_vm0, %v759_v14, 0.0  ;;  %v1627_v8 = vsel %vm589_vm13, %v761_v6, 0.0  ;;  %v762_v44 = vsel %vm558_vm2, %v730_v50, 0.0 }
 0x149   : > { %v763_v36 = vsel %vm559_vm3, %v731_v33, 0.0  ;;  %v794_v63 = vmul.f32 %v762_v44, %v762_v44  ;;  %v764_v21 = vsel %vm560_vm4, %v732_v1, 0.0  ;;  %v735_v30 = vsub.f32 %v1373_v60, %v1609_v0 }
 0x14a   : > { %v795_v35 = vmul.f32 %v763_v36, %v763_v36  ;;  %v765_v25 = vsel %vm561_vm5, %v733_v31, 0.0  ;;  %v796_v29 = vmul.f32 %v764_v21, %v764_v21  ;;  %v736_v23 = vsub.f32 %v1356_v51, %v1609_v0 }
 0x14b   : > { %v766_v34 = vsel %vm562_vm6, %v734_v10, 0.0  ;;  %v797_v22 = vmul.f32 %v765_v25, %v765_v25  ;;  %v737_v28 = vsub.f32 %v1370_v58, %v1609_v0  ;;  %v767_v53 = vsel %vm563_vm7, %v735_v30, 0.0 }
 0x14c   : > { %v826_v27 = vadd.f32 %v795_v35, %v794_v63  ;;  %v798_v60 = vmul.f32 %v766_v34, %v766_v34  ;;  %v738_v32 = vsub.f32 %v1408_v13, %v1609_v0  ;;  %v768_v61 = vsel %vm564_vm8, %v736_v23, 0.0 }
 0x14d   : > { %v799_v51 = vmul.f32 %v767_v53, %v767_v53  ;;  %v739_v37 = vsub.f32 %v1421_v20, %v1609_v0  ;;  %v769_v14 = vsel %vm565_vm9, %v737_v28, 0.0  ;;  %v800_v58 = vmul.f32 %v768_v61, %v768_v61  ;;  %v1859_v61 = vld [vmem:[#allocation11_spill] sm:$0xff] }
 0x14e   : > { %v827_v17 = vadd.f32 %v826_v27, %v796_v29  ;;  %v740_v42 = vsub.f32 %v1404_v11, %v1609_v0  ;;  %v770_v50 = vsel %vm566_vm10, %v738_v32, 0.0  ;;  %v801_v13 = vmul.f32 %v769_v14, %v769_v14  ;;  %v1861_v14 = vld [vmem:[#allocation12_spill] sm:$0xff] }
 0x14f   : > { %v741_v47 = vsub.f32 %v1418_v18, %v1609_v0  ;;  %v771_v1 = vsel %vm567_vm11, %v739_v37, 0.0  ;;  %v802_v20 = vmul.f32 %v770_v50, %v770_v50  ;;  %v742_v55 = vsub.f32 %v1459_v59, %v1609_v0  ;;  %v1863_v50 = vld [vmem:[#allocation13_spill] sm:$0xff] }
 0x150   : > { %v828_v19 = vadd.f32 %v827_v17, %v797_v22  ;;  %vm1849_vm2 = vcmp.lt.s32.totalorder %v1395_v7, 512  ;;  %v803_v11 = vmul.f32 %v771_v1, %v771_v1  ;;  %vm1850_vm3 = vcmp.lt.s32.totalorder %v1411_v15, 512  ;;  %v1855_v17 = vld [vmem:[#allocation8_spill] sm:$0xff]  ;;  %v1865_v1 = vld [vmem:[#allocation14_spill] sm:$0xff] }
 0x151   : > { %v772_v36 = vsel %vm1849_vm2, %v740_v42, 0.0  ;;  %v773_v62 = vsel %vm1850_vm3, %v741_v47, 0.0  ;;  %v744_v18 = vsub.f32 %v1452_v54, %v1609_v0  ;;  %vm1851_vm4 = vcmp.lt.s32.totalorder %v1425_v24, 512  ;;  %v1853_v24 = vld [vmem:[#allocation7_spill] sm:$0xff] }
 0x152   : > { %v829_v40 = vadd.f32 %v828_v19, %v798_v60  ;;  %v804_v63 = vmul.f32 %v772_v36, %v772_v36  ;;  %v774_v2 = vsel %vm1851_vm4, %v742_v55, 0.0  ;;  %v805_v10 = vmul.f32 %v773_v62, %v773_v62  ;;  %v1868_v62 = vld [vmem:[#allocation15_spill] sm:$0xff] }
 0x153   : > { %v745_v59 = vsub.f32 %v1469_v4, %v1609_v0  ;;  %v806_v7 = vmul.f32 %v774_v2, %v774_v2  ;;  %v746_v25 = vsub.f32 %v1344_v45, %v1609_v0  ;;  %vm1852_vm5 = vcmp.lt.s32.totalorder %v1444_v46, 512  ;;  %v1870_v2 = vld [vmem:[#allocation16_spill] sm:$0xff] }
 0x154   : > { %v830_v6 = vadd.f32 %v829_v40, %v799_v51  ;;  %v776_v15 = vsel %vm1852_vm5, %v744_v18, 0.0  ;;  %v807_v29 = vmul.f32 %v775_v16, %v775_v16  ;;  %v747_v54 = vsub.f32 %v1358_v52, %v1609_v0  ;;  %v1857_v16 = vld [vmem:[#allocation9_spill] sm:$0xff] }
 0x155   : > { %vm1854_vm6 = vcmp.lt.s32.totalorder %v1853_v24, 512  ;;  %v808_v34 = vmul.f32 %v776_v15, %v776_v15  ;;  %v748_v4 = vsub.f32 %v1339_v43, %v1609_v0  ;;  %vm1856_vm7 = vcmp.lt.s32.totalorder %v1855_v17, 512  ;;  %v1875_v15 = vld [vmem:[#allocation10_spill] sm:$0xff] }
 0x156   : > { %v831_v33 = vadd.f32 %v830_v6, %v800_v58  ;;  %v777_v23 = vsel %vm1854_vm6, %v745_v59, 0.0  ;;  %v778_v28 = vsel %vm1856_vm7, %v746_v25, 0.0  ;;  %v749_v46 = vsub.f32 %v1351_v49, %v1609_v0 }
 0x157   : > { %v809_v45 = vmul.f32 %v777_v23, %v777_v23  ;;  %vm1858_vm8 = vcmp.lt.s32.totalorder %v1857_v16, 512  ;;  %v810_v52 = vmul.f32 %v778_v28, %v778_v28  ;;  %v750_v32 = vsub.f32 %v1392_v5, %v1609_v0 }
 0x158   : > { %v832_v44 = vadd.f32 %v831_v33, %v801_v13  ;;  %v779_v60 = vsel %vm1858_vm8, %v747_v54, 0.0  ;;  %vm1860_vm9 = vcmp.lt.s32.totalorder %v1859_v61, 512  ;;  %v751_v37 = vsub.f32 %v1406_v12, %v1609_v0 }
 0x159   : > { %v780_v51 = vsel %vm1860_vm9, %v748_v4, 0.0  ;;  %v811_v43 = vmul.f32 %v779_v60, %v779_v60  ;;  %vm1862_vm10 = vcmp.lt.s32.totalorder %v1861_v14, 512  ;;  %v752_v42 = vsub.f32 %v1387_v3, %v1609_v0 }
 0x15a   : > { %v833_v31 = vadd.f32 %v832_v44, %v802_v20  ;;  %v781_v58 = vsel %vm1862_vm10, %v749_v46, 0.0  ;;  %v812_v49 = vmul.f32 %v780_v51, %v780_v51  ;;  %vm1864_vm11 = vcmp.lt.s32.totalorder %v1863_v50, 512 }
 0x15b   : > { %v782_v13 = vsel %vm1864_vm11, %v750_v32, 0.0  ;;  %v813_v5 = vmul.f32 %v781_v58, %v781_v58  ;;  %v753_v47 = vsub.f32 %v1399_v9, %v1609_v0  ;;  %vm1866_vm13 = vcmp.lt.s32.totalorder %v1865_v1, 512 }
 0x15c   : > { %v834_v35 = vadd.f32 %v833_v31, %v803_v11  ;;  %v783_v20 = vsel %vm1866_vm13, %v751_v37, 0.0  ;;  %v814_v12 = vmul.f32 %v782_v13, %v782_v13  ;;  %v754_v55 = vsub.f32 %v1441_v41, %v1609_v0 }
 0x15d   : > { %vm1867_vm15 = vcmp.lt.s32.totalorder %v1529_v56, 512  ;;  %v815_v3 = vmul.f32 %v783_v20, %v783_v20  ;;  %v755_v31 = vsub.f32 %v1457_v57, %v1609_v0  ;;  %vm1869_vm0 = vcmp.lt.s32.totalorder %v1868_v62, 512  ;;  %v1872_v56 = vld [vmem:[#allocation6_spill] sm:$0xff] }
 0x15e   : > { %v835_v21 = vadd.f32 %v834_v35, %v804_v63  ;;  %v784_v36 = vsel %vm1867_vm15, %v752_v42, 0.0  ;;  %v785_v63 = vsel %vm1869_vm0, %v753_v47, 0.0  ;;  %v756_v18 = vsub.f32 %v1436_v39, %v1609_v0 }
 0x15f   : > { %v816_v9 = vmul.f32 %v784_v36, %v784_v36  ;;  %vm1871_vm2 = vcmp.lt.s32.totalorder %v1870_v2, 512  ;;  %v817_v41 = vmul.f32 %v785_v63, %v785_v63  ;;  %v757_v59 = vsub.f32 %v1872_v56, %v1609_v0 }
 0x160   : > { %v836_v30 = vadd.f32 %v835_v21, %v805_v10  ;;  %v786_v10 = vsel %vm1871_vm2, %v754_v55, 0.0  ;;  %v760_v17 = vsub.f32 %v1485_v26, %v1609_v0  ;;  %v825_v26 = vmul.f32 %v1627_v8, %v1627_v8 }
 0x161   : > { %v818_v57 = vmul.f32 %v786_v10, %v786_v10 }
 0x162   : > { %v837_v27 = vadd.f32 %v836_v30, %v806_v7  ;;  %v1873_v7 = vld [vmem:[#allocation17_spill] sm:$0xff] }
 0x163   : > { %vm1874_vm3 = vcmp.lt.s32.totalorder %v1873_v7, 512 }
 0x164   : > { %v838_v22 = vadd.f32 %v837_v27, %v807_v29  ;;  %v787_v30 = vsel %vm1874_vm3, %v755_v31, 0.0  ;;  %v758_v29 = vsub.f32 %v1875_v15, %v1609_v0  ;;  %v1876_v27 = vld [vmem:[#allocation18_spill] sm:$0xff] }
 0x165   : > { %vm1877_vm4 = vcmp.lt.s32.totalorder %v1876_v27, 512  ;;  %v819_v39 = vmul.f32 %v787_v30, %v787_v30 }
 0x166   : > { %v839_v53 = vadd.f32 %v838_v22, %v808_v34  ;;  %v788_v54 = vsel %vm1877_vm4, %v756_v18, 0.0  ;;  %v789_v34 = vsel %vm585_vm14, %v757_v59, 0.0 }
 0x167   : > { %v820_v22 = vmul.f32 %v788_v54, %v788_v54 }
 0x168   : > { %v840_v19 = vadd.f32 %v839_v53, %v809_v45  ;;  %v790_v45 = vsel %vm586_vm1, %v758_v29, 0.0  ;;  %v821_v53 = vmul.f32 %v789_v34, %v789_v34 }
 0x169   : > { %v822_v16 = vmul.f32 %v790_v45, %v790_v45 }
 0x16a   : > { %v841_v40 = vadd.f32 %v840_v19, %v810_v52  ;;  %v792_v52 = vsel %vm588_vm12, %v760_v17, 0.0  ;;  %v823_v19 = vmul.f32 %v1624_v48, %v1624_v48 }
 0x16b   : > { %v824_v61 = vmul.f32 %v792_v52, %v792_v52 }
 0x16c   : > { %v842_v6 = vadd.f32 %v841_v40, %v811_v43 }
 0x16e   : > { %v843_v33 = vadd.f32 %v842_v6, %v812_v49  ;;  %v1880_v6 = vld [vmem:[#allocation5_spill] sm:$0xff] }
 0x16f   : > { %vm864_vm12 = vcmp.eq.s32.totalorder %v1880_v6, 1  ;;  %vm863_vm14 = vcmp.eq.s32.totalorder %v1880_v6, 0 }
 0x170   : > { %v844_v44 = vadd.f32 %v843_v33, %v813_v5 }
 0x172   : > { %v845_v11 = vadd.f32 %v844_v44, %v814_v12 }
 0x174   : > { %v846_v35 = vadd.f32 %v845_v11, %v815_v3 }
 0x176   : > { %v847_v21 = vadd.f32 %v846_v35, %v816_v9 }
 0x178   : > { %v848_v25 = vadd.f32 %v847_v21, %v817_v41 }
 0x17a   : > { %v849_v24 = vadd.f32 %v848_v25, %v818_v57 }
 0x17c   : > { %v850_v4 = vadd.f32 %v849_v24, %v819_v39 }
 0x17e   : > { %v851_v46 = vadd.f32 %v850_v4, %v820_v22 }
 0x180   : > { %v852_v60 = vadd.f32 %v851_v46, %v821_v53 }
 0x182   : > { %v853_v32 = vadd.f32 %v852_v60, %v822_v16 }
 0x184   : > { %v854_v51 = vadd.f32 %v853_v32, %v823_v19 }
 0x186   : > { %v855_v43 = vadd.f32 %v854_v51, %v824_v61 }
 0x188   : > { %v856_v40 = vadd.f32 %v855_v43, %v825_v26 }
 0x18a   : > { %v857_v37 = vrot.slane %v856_v40, 4 }
 0x18c   : > { %v858_v14 = vadd.f32 %v857_v37, %v856_v40 }
 0x18e   : > { %v859_v58 = vrot.slane %v858_v14, 2 }
 0x190   : > { %v860_v49 = vadd.f32 %v859_v58, %v858_v14 }
 0x192   : > { %v861_v38 = vrot.slane %v860_v49, 1 }
 0x194   : > { %v862_v48 = vadd.f32 %v861_v38, %v860_v49 }
 0x196   : > { %v865_v42 = vsel %vm864_vm12, %v862_v48, 0.0 }
 0x197   : > { %v866_v8 = vsel %vm863_vm14, %v1609_v0, %v865_v42 }
 0x198   : > { %867 = vst [vmem:[%s137_s16] sm:$0xff] %v866_v8 }
 0x199   : > { %1126 = shalt.err (!%p1123_p4)
}
 0x19a   : > { %s1127_s28 = scalar_lea.hbm %s1752_s23, 128  ;;  %s1131_s3 = scalar_lea.hbm %s1797_s2, 256 }
 0x19b   : > { %p1128_p7 = scmp.ne.s32.totalorder %s1752_s23, %s1127_s28  ;;  %p1132_p10 = scmp.lt.u32.totalorder %s1752_s23, %s1797_s2 }
 0x19c   : > { %p1133_p11 = scmp.lt.u32.totalorder %s1131_s3, %s1127_s28  ;;  %p1135_p13 = scmp.lt.u32.totalorder %s1127_s28, %s1752_s23 }
 0x19d   : > { %p1129_p8 = pnand %p1128_p7, %p1231_p5 }
 0x19e   : > { %p1134_p12 = por %p1133_p11, %p1132_p10 }
 0x19f   : > { %p1130_p9 = pneg %p1129_p8 }
 0x1a0   : > { %p1136_p0 = por %p1135_p13, %p1134_p12 }
 0x1a2   : > { %p1137_p1 = pnand %p1136_p0, %p1130_p9 }
 0x1a4   : > { %1140 = shalt.err (!%p1137_p1)
}
 0x1a5   : > { %1053 = dma.vmem_to_hbm [thread:$0]  (%p1231_p5), %s1754_s17, 128, %s1752_s23, %s869_s13  }
 0x1a6 PF: > { %p1059_p2 = scmp.ge.s32.totalorder %s1175_s12, 2  ;;  %s894_s6 = sand.u32 1, %s1163_s9  }
 0x1a7   : > { %s895_s7 = scalar_lea.sflag [#allocation3], %s894_s6 }
 0x1a8   : > { %p1056_p3 = pnand %p1059_p2, %p1235_p6 }
 0x1aa   : > { %1158 = dma.done.wait (!%p1056_p3), %s895_s7, 128  }
 0x1ab   : > { %1160 = vsyncadd (!%p1056_p3), %s895_s7, 4294967168  ;;  %p12_p4 = scmp.ge.s32.totalorder %s1218_s15, 4   ;;  %s1881_s9 = smov %s1167_s10 }
 0x1ac   : > { %s1882_s10 = smov %s1171_s11  ;;  %s1883_s11 = smov %s1229_s18 }
 0x1ad   : > { %s1884_s12 = smov %s1218_s15  ;;  %14 = sbr.rel (!%p12_p4) target bundleno = 3 (0x3), region = 63 }
 0x1b4   :  { %900 = vsyncpa [#allocation3], 1 }
 0x1b5   :  { %902 = vsyncpa [#allocation3 + $0x1], 1 }

</bundles_post_ra>
